<compile_context>
chip_gen: v7x
topology: tpu7x:2x2x1
jax: 0.10.0
libtpu: 0.0.40
codegen_flags: <defaults>
</compile_context>

<pallas_src>
import functools

import jax
import jax.numpy as jnp
from jax.experimental import pallas as pl
from jax.experimental.pallas import tpu as pltpu


def _round_up(x, m):
    return (x + m - 1) // m * m


def _vmem_budget_bytes():
    """Generation-aware VMEM budget with ~25% headroom for compiler scratch."""
    try:
        info = pltpu.get_tpu_info()
        cap = int(getattr(info, "vmem_capacity_bytes", 64 * 1024 * 1024))
    except Exception:
        cap = 64 * 1024 * 1024  # conservative (v7x per-TensorCore)
    return int(cap * 0.75)


def logreg_kernel(x_ref, wt_ref, b_ref, o_ref):
    # S = x @ W^T + b, computed as x @ W_t with W_t pre-transposed in the
    # wrapper, so both MXU operands are consumed directly (no vxpose traffic).
    # bf16 inputs accumulate in f32 via preferred_element_type.
    s = jnp.dot(x_ref[...], wt_ref[...], preferred_element_type=jnp.float32)
    s = s + b_ref[...]                                  # f32 bias broadcast over rows
    # Row softmax, numerically stabilized, kept entirely in f32.
    m = jnp.max(s, axis=1, keepdims=True)
    e = jnp.exp(s - m)                                  # padded classes -> exp(-1e30 - m) == 0
    denom = jnp.sum(e, axis=1, keepdims=True)
    # Exact division: approx reciprocal's ~1e-3 error broke "rows sum to 1"
    # and would bias log-probs if P feeds an NLL loss.
    o_ref[...] = (e / denom).astype(o_ref.dtype)
    # TODO(synk): if the consumer is LogReg.loss (NLL), fuse it here by
    # emitting log-probs (s - m - log(denom)) instead of probabilities.


def prepare_logreg_params(w, b, *, pad_classes=True):
    """Once-per-model parameter prep (hoist OUT of the training/inference loop).

    nn.Linear weight (C, D) -> W^T (D, C_pad) with zero-padded class columns;
    bias -> (1, C_pad) float32 with -1e30 in padded slots so padded logits
    vanish under softmax.  C_pad is a multiple of 128 -> lane-dense output.
    """
    C, D = w.shape
    w_t = w.T                                           # (D, C), caller's dtype
    b2 = b.reshape(1, C).astype(jnp.float32)
    if pad_classes and C % 128 != 0:
        C_pad = _round_up(C, 128)
        w_t = jnp.pad(w_t, ((0, 0), (0, C_pad - C)))
        b2 = jnp.pad(b2, ((0, 0), (0, C_pad - C)), constant_values=-1e30)
    return w_t, b2


def logreg_apply(x, w_t, b2, *, num_classes=None, block_m=1024,
                 out_dtype=None, return_padded=False):
    """Hot-path forward: P = softmax(x @ w_t + b2) with prepared params."""
    N, D = x.shape
    D2, C_pad = w_t.shape
    assert D == D2, (D, D2)
    C = num_classes if num_classes is not None else C_pad
    out_dtype = out_dtype or x.dtype

    x_bytes = jnp.dtype(x.dtype).itemsize
    w_bytes = jnp.dtype(w_t.dtype).itemsize
    o_bytes = jnp.dtype(out_dtype).itemsize

    # --- VMEM accounting: resident W/bias + double-buffered x and output. ---
    # W^T / bias are requested single-buffered (pl.Buffered(1)); the 25%
    # headroom in the budget covers the double-buffered fallback.
    budget = _vmem_budget_bytes()
    fixed = D * C_pad * w_bytes + 8 * C_pad * 4
    per_row = 2 * D * x_bytes + 2 * C_pad * o_bytes
    if budget > fixed:
        tm_cap = max(8, int((budget - fixed) // max(per_row, 1)) // 8 * 8)
    else:
        tm_cap = 8
        # TODO(synk): if the resident (D, C_pad) W alone exceeds VMEM, tile the
        # contraction dim with an extra "arbitrary" grid axis + f32 accumulator.

    tm = min(block_m, tm_cap, _round_up(N, 8))
    if N > 8:
        # >= 2 grid steps so the "parallel" batch axis can shard across both
        # v7x TensorCores (no-op on single-core v5e/v6e).
        tm = min(tm, _round_up(-(-N // 2), 8))
    tm = max(8, tm // 8 * 8)

    grid = (pl.cdiv(N, tm),)  # no batch padding: boundary block handled by Pallas

    footprint = fixed + per_row * tm
    vmem_limit = int(min(max(2 * footprint, 16 * 1024 * 1024),
                         max(budget, footprint + (1 << 20))))

    def _run(single_buffer_weights):
        resident_kwargs = (
            dict(pipeline_mode=pl.Buffered(buffer_count=1))
            if single_buffer_weights else {}
        )
        in_specs = [
            pl.BlockSpec((tm, D), lambda i: (i, 0)),                       # x: tiled over batch
            pl.BlockSpec((D, C_pad), lambda i: (0, 0), **resident_kwargs),  # W^T: resident
            pl.BlockSpec((1, C_pad), lambda i: (0, 0), **resident_kwargs),  # bias: resident
        ]
        return pl.pallas_call(
            logreg_kernel,
            out_shape=jax.ShapeDtypeStruct((N, C_pad), out_dtype),
            grid=grid,
            in_specs=in_specs,
            out_specs=pl.BlockSpec((tm, C_pad), lambda i: (i, 0)),
            compiler_params=pltpu.CompilerParams(
                dimension_semantics=("parallel",),     # megacore-shardable batch axis
                vmem_limit_bytes=vmem_limit,
            ),
        )(x, w_t, b2)

    try:
        out = _run(True)
    except Exception:
        # pipeline_mode=pl.Buffered(1) not supported on this jax version:
        # fall back to default (double) buffering of the resident operands.
        out = _run(False)

    if return_padded or C_pad == C:
        return out                # no extra HBM pass; padded columns are exactly 0
    return out[:, :C]             # optional un-pad (one extra XLA copy)


def logreg_forward(x, w, b, **kwargs):
    """Convenience one-shot wrapper. In a loop, call prepare_logreg_params()
    once and logreg_apply() per step to avoid re-streaming W through HBM."""
    C = w.shape[0]
    w_t, b2 = prepare_logreg_params(w, b)
    return logreg_apply(x, w_t, b2, num_classes=C, **kwargs)


def reference_forward(x, w, b):
    s = x @ w.T + b
    return jax.nn.softmax(s, axis=1)


# TODO(synk): LogReg.loss (masked NLL over one-hot targets) is not part of
# forward() and is left to the host-side training loop (see fusion TODO above).

if __name__ == "__main__":
    key = jax.random.PRNGKey(0)
    k_x, k_w, k_b = jax.random.split(key, 3)

    N = 50               # not a multiple of the tile -> exercises boundary blocks
    in_features = 32
    out_features = 10    # not a multiple of 128 -> exercises class padding

    # nn.Linear default init: uniform(-1/sqrt(in_features), 1/sqrt(in_features))
    bound = 1.0 / (in_features ** 0.5)
    x = jax.random.normal(k_x, (N, in_features), dtype=jnp.float32)
    w = jax.random.uniform(k_w, (out_features, in_features),
                           minval=-bound, maxval=bound, dtype=jnp.float32)
    b = jax.random.uniform(k_b, (out_features,),
                           minval=-bound, maxval=bound, dtype=jnp.float32)

    # Hoisted once-per-model prep, then the hot-path apply (small block_m so
    # the grid has several batch tiles even at this toy size).
    w_t, b2 = prepare_logreg_params(w, b)
    P = logreg_apply(x, w_t, b2, num_classes=out_features, block_m=16)
    jax.block_until_ready(P)

    P_ref = reference_forward(x, w, b)
    assert P.shape == (N, out_features)
    assert jnp.allclose(P, P_ref, atol=2e-3, rtol=2e-3)
    assert jnp.allclose(jnp.sum(P, axis=1), jnp.ones((N,)), atol=1e-4)

    # bf16 input/weight stream (halves the dominant HBM traffic); softmax math
    # stays in f32 inside the kernel, output comes back in bf16.
    x_bf = x.astype(jnp.bfloat16)
    w_t_bf, b2_bf = prepare_logreg_params(w.astype(jnp.bfloat16), b)
    P_bf = logreg_apply(x_bf, w_t_bf, b2_bf, num_classes=out_features, block_m=16)
    jax.block_until_ready(P_bf)
    P_bf32 = P_bf.astype(jnp.float32)
    assert P_bf.shape == (N, out_features)
    assert jnp.allclose(P_bf32, P_ref, atol=3e-2, rtol=3e-2)
    assert jnp.allclose(jnp.sum(P_bf32, axis=1), jnp.ones((N,)), atol=2e-2)

    print("KERNEL_OK")
</pallas_src>

<mosaic_0001>
module attributes {stable_mosaic.version = 11 : i64} {
  func.func @logreg_kernel(%arg0: i32, %arg1: memref<16x32xf32, #tpu.memory_space<vmem>>, %arg2: memref<32x128xf32, #tpu.memory_space<vmem>>, %arg3: memref<1x128xf32, #tpu.memory_space<vmem>>, %arg4: memref<16x128xf32, #tpu.memory_space<vmem>>) attributes {dimension_semantics = [#tpu.dimension_semantics<parallel>], iteration_bounds = array<i64: 4>, scalar_prefetch = 0 : i64, scratch_operands = 0 : i64, tpu.core_type = #tpu.core_type<tc>, window_params = [{transform_indices = @transform_0, window_bounds = array<i64: 16, 32>}, {pipeline_mode = #tpu.pipeline_mode<synchronous>, transform_indices = @transform_1, window_bounds = array<i64: 32, 128>}, {pipeline_mode = #tpu.pipeline_mode<synchronous>, transform_indices = @transform_2, window_bounds = array<i64: 1, 128>}, {transform_indices = @transform_3, window_bounds = array<i64: 16, 128>}]} {
    %c0 = arith.constant 0 : index
    %c0_0 = arith.constant 0 : index
    %0 = vector.load %arg1[%c0, %c0_0] : memref<16x32xf32, #tpu.memory_space<vmem>>, vector<16x32xf32>
    %c0_1 = arith.constant 0 : index
    %c0_2 = arith.constant 0 : index
    %1 = vector.load %arg2[%c0_1, %c0_2] : memref<32x128xf32, #tpu.memory_space<vmem>>, vector<32x128xf32>
    %cst = arith.constant dense<0.000000e+00> : vector<16x128xf32>
    %2 = tpu.matmul %0, %1, %cst {dimension_numbers = #tpu.dot_dimension_numbers<[1], [0], [0], [1], [0, 0, 1, 1], [], []>} : vector<16x32xf32>, vector<32x128xf32>, vector<16x128xf32> -> vector<16x128xf32>
    %c0_3 = arith.constant 0 : index
    %c0_4 = arith.constant 0 : index
    %3 = vector.load %arg3[%c0_3, %c0_4] : memref<1x128xf32, #tpu.memory_space<vmem>>, vector<1x128xf32>
    %4 = vector.broadcast %3 : vector<1x128xf32> to vector<16x128xf32>
    %5 = arith.addf %2, %4 : vector<16x128xf32>
    %cst_5 = arith.constant dense<0xFF800000> : vector<16xf32>
    %6 = vector.multi_reduction <maximumf>, %5, %cst_5 [1] : vector<16x128xf32> to vector<16xf32>
    %7 = vector.shape_cast %6 : vector<16xf32> to vector<16x1xf32>
    %8 = vector.broadcast %7 : vector<16x1xf32> to vector<16x128xf32>
    %9 = arith.subf %5, %8 : vector<16x128xf32>
    %10 = math.exp %9 : vector<16x128xf32>
    %cst_6 = arith.constant dense<0.000000e+00> : vector<16xf32>
    %11 = vector.multi_reduction <add>, %10, %cst_6 [1] : vector<16x128xf32> to vector<16xf32>
    %12 = vector.shape_cast %11 : vector<16xf32> to vector<16x1xf32>
    %13 = vector.broadcast %12 : vector<16x1xf32> to vector<16x128xf32>
    %14 = arith.divf %10, %13 : vector<16x128xf32>
    %c0_7 = arith.constant 0 : index
    %c0_8 = arith.constant 0 : index
    %15 = vector.load %arg4[%c0_7, %c0_8] : memref<16x128xf32, #tpu.memory_space<vmem>>, vector<16x128xf32>
    tpu.vector_store %arg4[%c0_7, %c0_8], %14 {strides = array<i32>} : memref<16x128xf32, #tpu.memory_space<vmem>>, vector<16x128xf32>,
    return
  }
  func.func @transform_0(%arg0: i32) -> (i32, i32) {
    %c0_i32 = arith.constant 0 : i32
    %c0_i32_0 = arith.constant 0 : i32
    return %arg0, %c0_i32 : i32, i32
  }
  func.func @transform_1(%arg0: i32) -> (i32, i32) {
    %c0_i32 = arith.constant 0 : i32
    %c0_i32_0 = arith.constant 0 : i32
    %c0_i32_1 = arith.constant 0 : i32
    return %c0_i32, %c0_i32_0 : i32, i32
  }
  func.func @transform_2(%arg0: i32) -> (i32, i32) {
    %c0_i32 = arith.constant 0 : i32
    %c0_i32_0 = arith.constant 0 : i32
    %c0_i32_1 = arith.constant 0 : i32
    return %c0_i32, %c0_i32_0 : i32, i32
  }
  func.func @transform_3(%arg0: i32) -> (i32, i32) {
    %c0_i32 = arith.constant 0 : i32
    %c0_i32_0 = arith.constant 0 : i32
    return %arg0, %c0_i32 : i32, i32
  }
}

module attributes {stable_mosaic.version = 11 : i64} {
  func.func @logreg_kernel(%arg0: i32, %arg1: memref<16x32xf32, #tpu.memory_space<vmem>>, %arg2: memref<32x128xf32, #tpu.memory_space<vmem>>, %arg3: memref<1x128xf32, #tpu.memory_space<vmem>>, %arg4: memref<16x128xf32, #tpu.memory_space<vmem>>) attributes {dimension_semantics = [#tpu.dimension_semantics<parallel>], iteration_bounds = array<i64: 4>, scalar_prefetch = 0 : i64, scratch_operands = 0 : i64, tpu.core_type = #tpu.core_type<tc>, window_params = [{transform_indices = @transform_0, window_bounds = array<i64: 16, 32>}, {pipeline_mode = #tpu.pipeline_mode<synchronous>, transform_indices = @transform_1, window_bounds = array<i64: 32, 128>}, {pipeline_mode = #tpu.pipeline_mode<synchronous>, transform_indices = @transform_2, window_bounds = array<i64: 1, 128>}, {transform_indices = @transform_3, window_bounds = array<i64: 16, 128>}]} {
    %c0 = arith.constant 0 : index
    %c0_0 = arith.constant 0 : index
    %0 = vector.load %arg1[%c0, %c0_0] : memref<16x32xf32, #tpu.memory_space<vmem>>, vector<16x32xf32>
    %c0_1 = arith.constant 0 : index
    %c0_2 = arith.constant 0 : index
    %1 = vector.load %arg2[%c0_1, %c0_2] : memref<32x128xf32, #tpu.memory_space<vmem>>, vector<32x128xf32>
    %cst = arith.constant dense<0.000000e+00> : vector<16x128xf32>
    %2 = tpu.matmul %0, %1, %cst {dimension_numbers = #tpu.dot_dimension_numbers<[1], [0], [0], [1], [0, 0, 1, 1], [], []>} : vector<16x32xf32>, vector<32x128xf32>, vector<16x128xf32> -> vector<16x128xf32>
    %c0_3 = arith.constant 0 : index
    %c0_4 = arith.constant 0 : index
    %3 = vector.load %arg3[%c0_3, %c0_4] : memref<1x128xf32, #tpu.memory_space<vmem>>, vector<1x128xf32>
    %4 = vector.broadcast %3 : vector<1x128xf32> to vector<16x128xf32>
    %5 = arith.addf %2, %4 : vector<16x128xf32>
    %cst_5 = arith.constant dense<0xFF800000> : vector<16xf32>
    %6 = vector.multi_reduction <maximumf>, %5, %cst_5 [1] : vector<16x128xf32> to vector<16xf32>
    %7 = vector.shape_cast %6 : vector<16xf32> to vector<16x1xf32>
    %8 = vector.broadcast %7 : vector<16x1xf32> to vector<16x128xf32>
    %9 = arith.subf %5, %8 : vector<16x128xf32>
    %10 = math.exp %9 : vector<16x128xf32>
    %cst_6 = arith.constant dense<0.000000e+00> : vector<16xf32>
    %11 = vector.multi_reduction <add>, %10, %cst_6 [1] : vector<16x128xf32> to vector<16xf32>
    %12 = vector.shape_cast %11 : vector<16xf32> to vector<16x1xf32>
    %13 = vector.broadcast %12 : vector<16x1xf32> to vector<16x128xf32>
    %14 = arith.divf %10, %13 : vector<16x128xf32>
    %c0_7 = arith.constant 0 : index
    %c0_8 = arith.constant 0 : index
    %15 = vector.load %arg4[%c0_7, %c0_8] : memref<16x128xf32, #tpu.memory_space<vmem>>, vector<16x128xf32>
    tpu.vector_store %arg4[%c0_7, %c0_8], %14 {strides = array<i32>} : memref<16x128xf32, #tpu.memory_space<vmem>>, vector<16x128xf32>,
    return
  }
  func.func @transform_0(%arg0: i32) -> (i32, i32) {
    %c0_i32 = arith.constant 0 : i32
    %c0_i32_0 = arith.constant 0 : i32
    return %arg0, %c0_i32 : i32, i32
  }
  func.func @transform_1(%arg0: i32) -> (i32, i32) {
    %c0_i32 = arith.constant 0 : i32
    %c0_i32_0 = arith.constant 0 : i32
    %c0_i32_1 = arith.constant 0 : i32
    return %c0_i32, %c0_i32_0 : i32, i32
  }
  func.func @transform_2(%arg0: i32) -> (i32, i32) {
    %c0_i32 = arith.constant 0 : i32
    %c0_i32_0 = arith.constant 0 : i32
    %c0_i32_1 = arith.constant 0 : i32
    return %c0_i32, %c0_i32_0 : i32, i32
  }
  func.func @transform_3(%arg0: i32) -> (i32, i32) {
    %c0_i32 = arith.constant 0 : i32
    %c0_i32_0 = arith.constant 0 : i32
    return %arg0, %c0_i32 : i32, i32
  }
}

</mosaic_0001>

<bundles_post_ra>
// kernel: tpu_custom_call.1
= control target key start
LH: loop header
LB: loop body
LE: loop exit
PB: predicated region body
PF: predicated region fallthrough
CT: control target
= control target key end

     0   :  { %8 = vsyncpa [#allocation3], 0  ;;  %s705_s0 = inlined_call_operand.vmem [shape: f32[50,32], index: 0, kind: input, shape index: {}]   ;;  %s706_s1 = inlined_call_operand.vmem [shape: f32[32,128], index: 1, kind: input, shape index: {}]   ;;  %s707_s2 = inlined_call_operand.vmem [shape: f32[1,128], index: 2, kind: input, shape index: {}]   ;;  %s708_s3 = inlined_call_operand.hbm [shape: f32[50,128], index: 3, kind: output, shape index: {}]  }
   0x1   :  { %10 = vsyncpa [#allocation3 + $0x1], 0  ;;  %s573_s12 = smov 0   ;;  %s575_s13 = smov 0  }
   0x2   :  { %s577_s14 = smov 0   ;;  %s579_s15 = smov 0  }
   0x3 LB: > { %s594_s16 = sadd.s32 4294967295, %s548_s15   ;;  %s393_s17 = sadd.s32 4294967294, %s548_s15   ;;  %s548_s15 = sphi %s579_s15, %s714_s15   ;;  %s544_s14 = sphi %s577_s14, %s713_s14   ;;  %s540_s13 = sphi %s575_s13, %s712_s13   ;;  %s536_s12 = sphi %s573_s12, %s711_s12  }
   0x4   : > { %s598_s18 = sadd.s32 1, %s548_s15   ;;  %s91_s19 = sadd.s32 1, %s544_s14 }
   0x5   : > { %s88_s20 = ssub.s32 %s548_s15, %s598_s18  ;;  %p101_p0 = scmp.ne.s32.totalorder %s544_s14, %s540_s13 }
   0x6   : > { %p89_p1 = scmp.eq.s32.totalorder %s88_s20, 0  ;;  %p102_p2 = scmp.eq.s32.totalorder %s594_s16, 3 }
   0x7   : > { %p107_p3 = scmp.ne.s32.totalorder %s540_s13, %s536_s12  ;;  %p108_p4 = scmp.eq.s32.totalorder %s393_s17, 3 }
   0x8   : > { %s609_s21 = scalar_select %p89_p1, %s544_s14, %s91_s19  }
   0x9   : > { %p611_p5 = por %p102_p2, %p101_p0  ;;  %p615_p6 = por %p108_p4, %p107_p3 }
   0xa   : > { %p396_p7 = scmp.ge.s32.totalorder %s548_s15, 1  ;;  %p149_p8 = scmp.lt.s32.totalorder %s548_s15, 5 }
   0xc   : > { %p150_p9 = pnand %p396_p7, %p149_p8 }
   0xd   : > { %v198_v0 = vld [vmem:[%s706_s1] sm:$0xff] (!%p150_p9)  ;;  %v199_v1 = vld [vmem:[%s706_s1 + $0x8] sm:$0xff] (!%p150_p9)  ;;  %v200_v2 = vld [vmem:[%s706_s1 + $0x10] sm:$0xff] (!%p150_p9)  ;;  %s631_s30 = sshll.u32 (!%p150_p9), %s594_s16, 1  ;;  %vm209_vm0 = vcmask (!%p150_p9), 261120   ;;  %s174_s19 = sand.u32 (!%p150_p9), 1, %s540_s13  }
   0xe   : > { %153 = sbr.rel (%p150_p9) target bundleno = 587 (0x24b), region = 32  ;;  %v430_v3 = vpack.c.bf16 (!%p150_p9), %v199_v1, %v198_v0  ;;  %v201_v4 = vld [vmem:[%s706_s1 + $0x18] sm:$0xff] (!%p150_p9)  ;;  %p182_p10 = scmp.lt.s32.totalorder (!%p150_p9), %s631_s30, 6  ;;  %v400_v8 = vld [vmem:[%s707_s2] ss:$0 sm:$0xff] (!%p150_p9) }
   0xf   : > { %v434_v5 = vpack.c.bf16 (!%p150_p9), %v201_v4, %v200_v2  ;;  %s397_s20 = sshll.u32 (!%p150_p9), %s174_s19, 4  ;;  %s645_s25 = scalar_lea.sflag (!%p150_p9), [#allocation3], %s174_s19 }
  0x10   : > { %431 = vmatprep.subr.bf16.mxu0 (!%p150_p9), %v430_v3  ;;  %s176_s24 = scalar_lea.vmem (!%p150_p9), [#allocation2], %s397_s20 }
  0x11   : > { %433 = vmatpush3.bf16.msra.mxu0 (!%p150_p9), %v430_v3 }
  0x12   : > { %435 = vmatprep.subr.bf16.mxu0 (!%p150_p9), %v434_v5 }
  0x15   : > { %s183_s6 = scalar_select %p182_p10, %s631_s30, 6  ;;  %437 = vmatpush3.bf16.msra.mxu0 %v434_v5 }
  0x16   : > { %s320_s26 = ssub.s32 (%p611_p5), 7, %s631_s30 }
  0x17   : > { %s399_s7 = sshll.u32 %s183_s6, 3  ;;  %p321_p11 = scmp.lt.s32.totalorder (%p611_p5), %s320_s26, 2 }
  0x18   : > { %s185_s10 = scalar_lea.vmem %s705_s0, %s399_s7 }
  0x19   : > { %v196_v6 = vld [vmem:[%s185_s10] sm:$0xff]  ;;  %v197_v7 = vld [vmem:[%s185_s10 + $0x8] sm:$0xff] }
  0x1a   : > { %427 = vmatprep.mubr.msk.f32.mxu0 %vm209_vm0, %v196_v6 }
  0x1b   : > { %428 = vmatmul.mubr.msk.f32.vlgmr.msra.gmra.mrb[0].mxu0 %vm209_vm0, %v197_v7 }
  0xee   : > { %v429_v9 = vpop.f32.mrb[0].mxu0 }
  0xef   : > { %v282_v10 = vpop.f32.mrb[1].mxu0  ;;  %v288_v12 = vadd.f32 %v429_v9, %v400_v8 }
  0xf0   : > { %v283_v11 = vadd.f32 %v400_v8, %v282_v10 }
  0xf2   : > { %291 = vmax.xlane.f32.xlu0 %v283_v11 }
  0xf6   : > { %293 = vmax.xlane.f32.xlu0 %v288_v12 }
 0x17f   : > { %v292_v13 = vpop.xlane.xlu0 %291 }
 0x180   : > { %v295_v14 = vsub.f32 %v283_v11, %v292_v13 }
 0x182   : > { %v297_v15 = vmul.f32 1.442695, %v295_v14 }
 0x183   : > { %v294_v16 = vpop.xlane.xlu0 %293 }
 0x184   : > { %478 = vpow2.f32 %v297_v15  ;;  %v296_v17 = vsub.f32 %v288_v12, %v294_v16 }
 0x186   : > { %v299_v18 = vmul.f32 1.442695, %v296_v17 }
 0x188   : > { %480 = vpow2.f32 %v299_v18 }
 0x18e   : > { %v479_v19 = vpop.eup %478 }
 0x18f   : > { %301 = vadd.xlane.f32.xlu1 %v479_v19 }
 0x192   : > { %v481_v20 = vpop.eup %480 }
 0x193   : > { %303 = vadd.xlane.f32.xlu1 %v481_v20 }
 0x21c   : > { %v302_v21 = vpop.xlane.xlu1 %301 }
 0x21d   : > { %482 = vrcp.f32 %v302_v21 }
 0x220   : > { %v304_v22 = vpop.xlane.xlu1 %303 }
 0x221   : > { %484 = vrcp.f32 %v304_v22 }
 0x227   : > { %v483_v23 = vpop.eup %482 }
 0x228   : > { %v306_v24 = vmul.f32 %v483_v23, %v479_v19  ;;  %318 = sbr.rel (!%p611_p5) target bundleno = 587 (0x24b), region = 36 }
 0x22a   : > { %309 = vst [vmem:[%s176_s24] sm:$0xff] %v306_v24 }
 0x22b   : > { %v485_v25 = vpop.eup %484 }
 0x22c   : > { %v308_v26 = vmul.f32 %v485_v25, %v481_v20 }
 0x22e   : > { %310 = vst [vmem:[%s176_s24 + $0x8] sm:$0xff] %v308_v26 }
 0x22f   : > { %s716_s26 = smov (!%p321_p11, %s320_s26), 2 }
 0x230   : > { %s650_s27 = sshll.u32 %s716_s26, 7 }
 0x231   : > { %s325_s28 = ssub.s32 256, %s650_s27 }
 0x232   : > { %326 = vsyncadd %s645_s25, %s325_s28  ;;  %p406_p12 = scmp.ne.s32.totalorder %s650_s27, 0  ;;  %s412_s29 = sshll.u32 %s594_s16, 8 }
 0x233   : > { %s659_s22 = scalar_lea.hbm %s708_s3, %s412_s29  ;;  %s331_s6 = sshll.u32 %s176_s24, 4  ;;  %s661_s6 = int_to_ptr.vmem [resolvable:$true] %s331_s6 }
 0x234   : > { %s486_s30 = scalar_lea.vmem %s661_s6, %s650_s27  ;;  %s550_s7 = smov [#allocation2]  }
 0x235   : > { %p487_p13 = scmp.ne.s32.totalorder %s661_s6, %s486_s30  ;;  %s490_s8 = sshll.u32 %s550_s7, 4  ;;  %s491_s8 = int_to_ptr.vmem [resolvable:$false] %s490_s8 }
 0x236   : > { %s492_s16 = scalar_lea.vmem %s491_s8, 512  ;;  %p493_p2 = scmp.lt.s32.totalorder %s661_s6, %s491_s8 }
 0x237   : > { %p488_p0 = pnand %p487_p13, %p406_p12  ;;  %p494_p3 = scmp.lt.s32.totalorder %s492_s16, %s486_s30 }
 0x239   : > { %p489_p1 = pneg %p488_p0  ;;  %p495_p4 = por %p494_p3, %p493_p2 }
 0x23b   : > { %p496_p5 = pnand %p495_p4, %p489_p1 }
 0x23d   : > { %499 = shalt.err (!%p496_p5)
}
 0x23e   : > { %s500_s9 = scalar_lea.hbm %s659_s22, %s650_s27  ;;  %s504_s17 = scalar_lea.hbm %s708_s3, 896 }
 0x23f   : > { %p501_p7 = scmp.ne.s32.totalorder %s659_s22, %s500_s9  ;;  %p505_p10 = scmp.lt.u32.totalorder %s659_s22, %s708_s3 }
 0x240   : > { %p506_p11 = scmp.lt.u32.totalorder %s504_s17, %s500_s9  ;;  %p508_p0 = scmp.lt.u32.totalorder %s500_s9, %s659_s22 }
 0x241   : > { %p502_p8 = pnand %p501_p7, %p406_p12 }
 0x242   : > { %p507_p13 = por %p506_p11, %p505_p10 }
 0x243   : > { %p503_p9 = pneg %p502_p8 }
 0x244   : > { %p509_p1 = por %p508_p0, %p507_p13 }
 0x246   : > { %p510_p2 = pnand %p509_p1, %p503_p9 }
 0x248   : > { %513 = shalt.err (!%p510_p2)
}
 0x249   : > { %s551_s24 = smov 128   ;;  %s552_s26 = smov 8  }
 0x24a   : > { %337 = dma.vmem_to_hbm [thread:$0]  (%p406_p12), %s661_s6, %s650_s27, %s659_s22, %s645_s25, %s551_s24, %s551_s24, %s552_s26  }
 0x24b PF: > { %p443_p3 = scmp.ge.s32.totalorder %s548_s15, 2  ;;  %s346_s28 = sand.u32 1, %s536_s12  }
 0x24c   : > { %s347_s29 = scalar_lea.sflag [#allocation3], %s346_s28 }
 0x24d   : > { %p440_p4 = pnand %p443_p3, %p615_p6 }
 0x24f   : > { %531 = dma.done.wait (!%p440_p4), %s347_s29, 256  }
 0x250   : > { %533 = vsyncadd (!%p440_p4), %s347_s29, 4294967040  ;;  %p13_p5 = scmp.ge.s32.totalorder %s598_s18, 6   ;;  %s711_s12 = smov %s540_s13 }
 0x251   : > { %s712_s13 = smov %s544_s14  ;;  %s713_s14 = smov %s609_s21 }
 0x252   : > { %s714_s15 = smov %s598_s18  ;;  %15 = sbr.rel (!%p13_p5) target bundleno = 3 (0x3), region = 67 }
 0x259   :  { %352 = vsyncpa [#allocation3], 1 }
 0x25a   :  { %354 = vsyncpa [#allocation3 + $0x1], 1 }

// kernel: tpu_custom_call.1
= control target key start
LH: loop header
LB: loop body
LE: loop exit
PB: predicated region body
PF: predicated region fallthrough
CT: control target
= control target key end

     0   :  { %8 = vsyncpa [#allocation3], 0  ;;  %s705_s0 = inlined_call_operand.vmem [shape: f32[50,32], index: 0, kind: input, shape index: {}]   ;;  %s706_s1 = inlined_call_operand.vmem [shape: f32[32,128], index: 1, kind: input, shape index: {}]   ;;  %s707_s2 = inlined_call_operand.vmem [shape: f32[1,128], index: 2, kind: input, shape index: {}]   ;;  %s708_s3 = inlined_call_operand.hbm [shape: f32[50,128], index: 3, kind: output, shape index: {}]  }
   0x1   :  { %10 = vsyncpa [#allocation3 + $0x1], 0  ;;  %s573_s12 = smov 0   ;;  %s575_s13 = smov 0  }
   0x2   :  { %s577_s14 = smov 0   ;;  %s579_s15 = smov 0  }
   0x3 LB: > { %s594_s16 = sadd.s32 4294967295, %s548_s15   ;;  %s393_s17 = sadd.s32 4294967294, %s548_s15   ;;  %s548_s15 = sphi %s579_s15, %s714_s15   ;;  %s544_s14 = sphi %s577_s14, %s713_s14   ;;  %s540_s13 = sphi %s575_s13, %s712_s13   ;;  %s536_s12 = sphi %s573_s12, %s711_s12  }
   0x4   : > { %s598_s18 = sadd.s32 1, %s548_s15   ;;  %s91_s19 = sadd.s32 1, %s544_s14 }
   0x5   : > { %s88_s20 = ssub.s32 %s548_s15, %s598_s18  ;;  %p101_p0 = scmp.ne.s32.totalorder %s544_s14, %s540_s13 }
   0x6   : > { %p89_p1 = scmp.eq.s32.totalorder %s88_s20, 0  ;;  %p102_p2 = scmp.eq.s32.totalorder %s594_s16, 3 }
   0x7   : > { %p107_p3 = scmp.ne.s32.totalorder %s540_s13, %s536_s12  ;;  %p108_p4 = scmp.eq.s32.totalorder %s393_s17, 3 }
   0x8   : > { %s609_s21 = scalar_select %p89_p1, %s544_s14, %s91_s19  }
   0x9   : > { %p611_p5 = por %p102_p2, %p101_p0  ;;  %p615_p6 = por %p108_p4, %p107_p3 }
   0xa   : > { %p396_p7 = scmp.ge.s32.totalorder %s548_s15, 1  ;;  %p149_p8 = scmp.lt.s32.totalorder %s548_s15, 5 }
   0xc   : > { %p150_p9 = pnand %p396_p7, %p149_p8 }
   0xd   : > { %v198_v0 = vld [vmem:[%s706_s1] sm:$0xff] (!%p150_p9)  ;;  %v199_v1 = vld [vmem:[%s706_s1 + $0x8] sm:$0xff] (!%p150_p9)  ;;  %v200_v2 = vld [vmem:[%s706_s1 + $0x10] sm:$0xff] (!%p150_p9)  ;;  %s631_s30 = sshll.u32 (!%p150_p9), %s594_s16, 1  ;;  %vm209_vm0 = vcmask (!%p150_p9), 261120   ;;  %s174_s19 = sand.u32 (!%p150_p9), 1, %s540_s13  }
   0xe   : > { %153 = sbr.rel (%p150_p9) target bundleno = 587 (0x24b), region = 32  ;;  %v430_v3 = vpack.c.bf16 (!%p150_p9), %v199_v1, %v198_v0  ;;  %v201_v4 = vld [vmem:[%s706_s1 + $0x18] sm:$0xff] (!%p150_p9)  ;;  %p182_p10 = scmp.lt.s32.totalorder (!%p150_p9), %s631_s30, 6  ;;  %v400_v8 = vld [vmem:[%s707_s2] ss:$0 sm:$0xff] (!%p150_p9) }
   0xf   : > { %v434_v5 = vpack.c.bf16 (!%p150_p9), %v201_v4, %v200_v2  ;;  %s397_s20 = sshll.u32 (!%p150_p9), %s174_s19, 4  ;;  %s645_s25 = scalar_lea.sflag (!%p150_p9), [#allocation3], %s174_s19 }
  0x10   : > { %431 = vmatprep.subr.bf16.mxu0 (!%p150_p9), %v430_v3  ;;  %s176_s24 = scalar_lea.vmem (!%p150_p9), [#allocation2], %s397_s20 }
  0x11   : > { %433 = vmatpush3.bf16.msra.mxu0 (!%p150_p9), %v430_v3 }
  0x12   : > { %435 = vmatprep.subr.bf16.mxu0 (!%p150_p9), %v434_v5 }
  0x15   : > { %s183_s6 = scalar_select %p182_p10, %s631_s30, 6  ;;  %437 = vmatpush3.bf16.msra.mxu0 %v434_v5 }
  0x16   : > { %s320_s26 = ssub.s32 (%p611_p5), 7, %s631_s30 }
  0x17   : > { %s399_s7 = sshll.u32 %s183_s6, 3  ;;  %p321_p11 = scmp.lt.s32.totalorder (%p611_p5), %s320_s26, 2 }
  0x18   : > { %s185_s10 = scalar_lea.vmem %s705_s0, %s399_s7 }
  0x19   : > { %v196_v6 = vld [vmem:[%s185_s10] sm:$0xff]  ;;  %v197_v7 = vld [vmem:[%s185_s10 + $0x8] sm:$0xff] }
  0x1a   : > { %427 = vmatprep.mubr.msk.f32.mxu0 %vm209_vm0, %v196_v6 }
  0x1b   : > { %428 = vmatmul.mubr.msk.f32.vlgmr.msra.gmra.mrb[0].mxu0 %vm209_vm0, %v197_v7 }
  0xee   : > { %v429_v9 = vpop.f32.mrb[0].mxu0 }
  0xef   : > { %v282_v10 = vpop.f32.mrb[1].mxu0  ;;  %v288_v12 = vadd.f32 %v429_v9, %v400_v8 }
  0xf0   : > { %v283_v11 = vadd.f32 %v400_v8, %v282_v10 }
  0xf2   : > { %291 = vmax.xlane.f32.xlu0 %v283_v11 }
  0xf6   : > { %293 = vmax.xlane.f32.xlu0 %v288_v12 }
 0x17f   : > { %v292_v13 = vpop.xlane.xlu0 %291 }
 0x180   : > { %v295_v14 = vsub.f32 %v283_v11, %v292_v13 }
 0x182   : > { %v297_v15 = vmul.f32 1.442695, %v295_v14 }
 0x183   : > { %v294_v16 = vpop.xlane.xlu0 %293 }
 0x184   : > { %478 = vpow2.f32 %v297_v15  ;;  %v296_v17 = vsub.f32 %v288_v12, %v294_v16 }
 0x186   : > { %v299_v18 = vmul.f32 1.442695, %v296_v17 }
 0x188   : > { %480 = vpow2.f32 %v299_v18 }
 0x18e   : > { %v479_v19 = vpop.eup %478 }
 0x18f   : > { %301 = vadd.xlane.f32.xlu1 %v479_v19 }
 0x192   : > { %v481_v20 = vpop.eup %480 }
 0x193   : > { %303 = vadd.xlane.f32.xlu1 %v481_v20 }
 0x21c   : > { %v302_v21 = vpop.xlane.xlu1 %301 }
 0x21d   : > { %482 = vrcp.f32 %v302_v21 }
 0x220   : > { %v304_v22 = vpop.xlane.xlu1 %303 }
 0x221   : > { %484 = vrcp.f32 %v304_v22 }
 0x227   : > { %v483_v23 = vpop.eup %482 }
 0x228   : > { %v306_v24 = vmul.f32 %v483_v23, %v479_v19  ;;  %318 = sbr.rel (!%p611_p5) target bundleno = 587 (0x24b), region = 36 }
 0x22a   : > { %309 = vst [vmem:[%s176_s24] sm:$0xff] %v306_v24 }
 0x22b   : > { %v485_v25 = vpop.eup %484 }
 0x22c   : > { %v308_v26 = vmul.f32 %v485_v25, %v481_v20 }
 0x22e   : > { %310 = vst [vmem:[%s176_s24 + $0x8] sm:$0xff] %v308_v26 }
 0x22f   : > { %s716_s26 = smov (!%p321_p11, %s320_s26), 2 }
 0x230   : > { %s650_s27 = sshll.u32 %s716_s26, 7 }
 0x231   : > { %s325_s28 = ssub.s32 256, %s650_s27 }
 0x232   : > { %326 = vsyncadd %s645_s25, %s325_s28  ;;  %p406_p12 = scmp.ne.s32.totalorder %s650_s27, 0  ;;  %s412_s29 = sshll.u32 %s594_s16, 8 }
 0x233   : > { %s659_s22 = scalar_lea.hbm %s708_s3, %s412_s29  ;;  %s331_s6 = sshll.u32 %s176_s24, 4  ;;  %s661_s6 = int_to_ptr.vmem [resolvable:$true] %s331_s6 }
 0x234   : > { %s486_s30 = scalar_lea.vmem %s661_s6, %s650_s27  ;;  %s550_s7 = smov [#allocation2]  }
 0x235   : > { %p487_p13 = scmp.ne.s32.totalorder %s661_s6, %s486_s30  ;;  %s490_s8 = sshll.u32 %s550_s7, 4  ;;  %s491_s8 = int_to_ptr.vmem [resolvable:$false] %s490_s8 }
 0x236   : > { %s492_s16 = scalar_lea.vmem %s491_s8, 512  ;;  %p493_p2 = scmp.lt.s32.totalorder %s661_s6, %s491_s8 }
 0x237   : > { %p488_p0 = pnand %p487_p13, %p406_p12  ;;  %p494_p3 = scmp.lt.s32.totalorder %s492_s16, %s486_s30 }
 0x239   : > { %p489_p1 = pneg %p488_p0  ;;  %p495_p4 = por %p494_p3, %p493_p2 }
 0x23b   : > { %p496_p5 = pnand %p495_p4, %p489_p1 }
 0x23d   : > { %499 = shalt.err (!%p496_p5)
}
 0x23e   : > { %s500_s9 = scalar_lea.hbm %s659_s22, %s650_s27  ;;  %s504_s17 = scalar_lea.hbm %s708_s3, 896 }
 0x23f   : > { %p501_p7 = scmp.ne.s32.totalorder %s659_s22, %s500_s9  ;;  %p505_p10 = scmp.lt.u32.totalorder %s659_s22, %s708_s3 }
 0x240   : > { %p506_p11 = scmp.lt.u32.totalorder %s504_s17, %s500_s9  ;;  %p508_p0 = scmp.lt.u32.totalorder %s500_s9, %s659_s22 }
 0x241   : > { %p502_p8 = pnand %p501_p7, %p406_p12 }
 0x242   : > { %p507_p13 = por %p506_p11, %p505_p10 }
 0x243   : > { %p503_p9 = pneg %p502_p8 }
 0x244   : > { %p509_p1 = por %p508_p0, %p507_p13 }
 0x246   : > { %p510_p2 = pnand %p509_p1, %p503_p9 }
 0x248   : > { %513 = shalt.err (!%p510_p2)
}
 0x249   : > { %s551_s24 = smov 128   ;;  %s552_s26 = smov 8  }
 0x24a   : > { %337 = dma.vmem_to_hbm [thread:$0]  (%p406_p12), %s661_s6, %s650_s27, %s659_s22, %s645_s25, %s551_s24, %s551_s24, %s552_s26  }
 0x24b PF: > { %p443_p3 = scmp.ge.s32.totalorder %s548_s15, 2  ;;  %s346_s28 = sand.u32 1, %s536_s12  }
 0x24c   : > { %s347_s29 = scalar_lea.sflag [#allocation3], %s346_s28 }
 0x24d   : > { %p440_p4 = pnand %p443_p3, %p615_p6 }
 0x24f   : > { %531 = dma.done.wait (!%p440_p4), %s347_s29, 256  }
 0x250   : > { %533 = vsyncadd (!%p440_p4), %s347_s29, 4294967040  ;;  %p13_p5 = scmp.ge.s32.totalorder %s598_s18, 6   ;;  %s711_s12 = smov %s540_s13 }
 0x251   : > { %s712_s13 = smov %s544_s14  ;;  %s713_s14 = smov %s609_s21 }
 0x252   : > { %s714_s15 = smov %s598_s18  ;;  %15 = sbr.rel (!%p13_p5) target bundleno = 3 (0x3), region = 67 }
 0x259   :  { %352 = vsyncpa [#allocation3], 1 }
 0x25a   :  { %354 = vsyncpa [#allocation3 + $0x1], 1 }

</bundles_post_ra>
